<compile_context>
chip_gen: v7x
topology: tpu7x:2x2x1
jax: 0.10.0
libtpu: 0.0.40
codegen_flags: <defaults>
</compile_context>

<pallas_src>
import functools

import jax
import jax.numpy as jnp
from jax.experimental import pallas as pl
from jax.experimental.pallas import tpu as pltpu


def _round_up(v, m):
    return ((v + m - 1) // m) * m


def _pick_tile(total, target, align):
    """Largest multiple of `align` that divides `total` and is <= max(target, align).

    `total` must itself be a multiple of `align` (so `align` always divides)."""
    target = max(min(target, total), align)
    t = (target // align) * align
    while total % t:
        t -= align
    return t


# ---------------------------------------------------------------------------
# Kernels
# ---------------------------------------------------------------------------

def _linear_kernel_f32out(x_ref, w_ref, b_ref, o_ref, *, compute_dtype):
    """out = x @ w + b, accumulating directly into the f32 output tile.

    The output index_map ignores k, so o_ref stays VMEM-resident across the
    whole reduction -> no separate accumulator scratch, no epilogue copy."""
    k = pl.program_id(2)

    @pl.when(k == 0)
    def _init():
        # Fold the bias add into the accumulator init (broadcast over rows).
        o_ref[...] = jnp.broadcast_to(b_ref[...], o_ref.shape)

    o_ref[...] += jnp.dot(
        x_ref[...].astype(compute_dtype),   # in-kernel cast: x stays uncopied in HBM
        w_ref[...],
        preferred_element_type=jnp.float32,
    )


def _linear_kernel_scratch(x_ref, w_ref, b_ref, o_ref, acc_ref, *, compute_dtype):
    """Variant with an f32 scratch accumulator + final cast (non-f32 outputs)."""
    k = pl.program_id(2)

    @pl.when(k == 0)
    def _init():
        acc_ref[...] = jnp.broadcast_to(b_ref[...], acc_ref.shape)

    acc_ref[...] += jnp.dot(
        x_ref[...].astype(compute_dtype),
        w_ref[...],
        preferred_element_type=jnp.float32,
    )

    @pl.when(k == pl.num_programs(2) - 1)
    def _finalize():
        o_ref[...] = acc_ref[...].astype(o_ref.dtype)


# ---------------------------------------------------------------------------
# Wrappers
# ---------------------------------------------------------------------------

def prepare_classifier_params(weight_t, bias, *, compute_dtype=jnp.bfloat16):
    """ONE-TIME prep (cache the result next to the params; do NOT call per step).

    Pads the (IN, OUT) transposed weight to lane-aligned (K, N) multiples of 128
    and casts to the compute dtype; pads the bias to (1, N) f32.  Zero padding
    is mathematically exact (padded K rows contribute 0; padded N cols are
    sliced off after the kernel)."""
    in_size, out_size = weight_t.shape
    K = _round_up(in_size, 128)
    N = _round_up(out_size, 128)
    w_p = (
        jnp.zeros((K, N), compute_dtype)
        .at[:in_size, :out_size]
        .set(weight_t.astype(compute_dtype))
    )
    b_p = jnp.zeros((1, N), jnp.float32).at[0, :out_size].set(bias.astype(jnp.float32))
    return w_p, b_p, in_size, out_size


def classifier_forward(
    x,
    w_padded,
    b_padded,
    in_size,
    out_size,
    *,
    tm=512,        # callers with very large B may raise this so the weight is streamed once
    tn=512,
    tk=2048,
    weight_buffers=3,
    force_pallas=False,
):
    """out = x @ W^T + b  (matches torch nn.Linear; w_padded is the pre-padded W^T)."""
    B, IN = x.shape
    assert IN == in_size
    K, N = w_padded.shape
    compute_dtype = w_padded.dtype
    out_dtype = x.dtype

    # Byte-based XLA fallback: below a few MB of weight traffic, launch overhead
    # dominates.  Same compute dtype as the Pallas path -> consistent numerics.
    weight_bytes = K * N * w_padded.dtype.itemsize
    if not force_pallas and weight_bytes < (4 << 20):
        out = jnp.dot(
            x.astype(compute_dtype),
            w_padded[:in_size, :out_size],
            preferred_element_type=jnp.float32,
        ) + b_padded[0, :out_size]
        return out.astype(out_dtype)

    # ---- Tile plan ---------------------------------------------------------
    M = _round_up(B, 16)                   # bf16 packs (16, 128) per vreg
    tm = _pick_tile(M, tm, 16)
    m_blocks = M // tm

    if m_blocks == 1 and N >= 256:
        # v7x megacore: guarantee >= 2 blocks on a 'parallel' grid axis.
        tn = min(tn, max(((N // 2) // 128) * 128, 128))
    tn = _pick_tile(N, tn, 128)
    tk = _pick_tile(K, tk, 128)
    n_blocks = N // tn
    k_blocks = K // tk
    grid = (m_blocks, n_blocks, k_blocks)

    # ---- x: no-copy fast path when already aligned --------------------------
    if M == B and K == IN:
        x_in = x                           # bf16 cast happens inside the kernel
    else:
        x_in = (
            jnp.zeros((M, K), compute_dtype)
            .at[:B, :IN]
            .set(x.astype(compute_dtype))
        )

    # ---- Specs ---------------------------------------------------------------
    x_spec = pl.BlockSpec((tm, tk), lambda i, j, k: (i, k))
    if weight_buffers != 2 and k_blocks > 2:
        # Deeper pipeline on the dominant (weight) HBM stream.
        w_spec = pl.BlockSpec(
            (tk, tn), lambda i, j, k: (k, j),
            pipeline_mode=pl.Buffered(weight_buffers),
        )
    else:
        w_spec = pl.BlockSpec((tk, tn), lambda i, j, k: (k, j))
    b_spec = pl.BlockSpec((1, tn), lambda i, j, k: (0, j))
    o_spec = pl.BlockSpec((tm, tn), lambda i, j, k: (i, j))

    compiler_params = pltpu.CompilerParams(
        dimension_semantics=("parallel", "parallel", "arbitrary"),
        vmem_limit_bytes=32 * 1024 * 1024,   # v5e scoped default is only 16 MiB
    )

    if out_dtype == jnp.float32:
        kernel = functools.partial(_linear_kernel_f32out, compute_dtype=compute_dtype)
        scratch_shapes = []
    else:
        kernel = functools.partial(_linear_kernel_scratch, compute_dtype=compute_dtype)
        scratch_shapes = [pltpu.VMEM((tm, tn), jnp.float32)]

    out_padded = pl.pallas_call(
        kernel,
        out_shape=jax.ShapeDtypeStruct((M, N), out_dtype),
        grid=grid,
        in_specs=[x_spec, w_spec, b_spec],
        out_specs=o_spec,
        scratch_shapes=scratch_shapes,
        compiler_params=compiler_params,
    )(x_in, w_padded, b_padded)

    if M == B and N == out_size:
        return out_padded                  # no-slice fast path
    return out_padded[:B, :out_size]


def init_classifier_params(key, input_size, output_size, dtype=jnp.float32):
    """Deterministic init mirroring nn.Linear (uniform +/- 1/sqrt(in)), bias=0."""
    bound = 1.0 / jnp.sqrt(jnp.asarray(input_size, dtype=jnp.float32))
    # PyTorch stores weight as (out, in); we keep the transpose (in, out).
    w = jax.random.uniform(
        key, (output_size, input_size), dtype=dtype, minval=-bound, maxval=bound
    )
    weight_t = jnp.transpose(w)  # (input_size, output_size)
    bias = jnp.zeros((output_size,), dtype=dtype)  # .bias.data.fill_(0)
    return weight_t, bias


if __name__ == "__main__":
    key = jax.random.PRNGKey(0)
    k_x, k_w = jax.random.split(key)

    batch, input_size, output_size = 8, 32, 16

    x = jax.random.normal(k_x, (batch, input_size), dtype=jnp.float32)
    weight_t, bias = init_classifier_params(k_w, input_size, output_size)

    # One-time prep: pad + cast the weight/bias (cached next to the params).
    w_p, b_p, in_sz, out_sz = prepare_classifier_params(weight_t, bias)

    # force_pallas=True so this tiny demo actually exercises the kernel
    # (the production path would take the byte-based XLA fallback at this size).
    out = classifier_forward(x, w_p, b_p, in_sz, out_sz, force_pallas=True)
    out = jax.block_until_ready(out)

    # Reference: same math (bf16-rounded inputs, f32 accumulation).
    x_bf = x.astype(jnp.bfloat16).astype(jnp.float32)
    w_bf = weight_t.astype(jnp.bfloat16).astype(jnp.float32)
    ref = x_bf @ w_bf + bias[None, :].astype(jnp.float32)

    assert out.shape == (batch, output_size)
    assert out.dtype == x.dtype
    assert jnp.allclose(out.astype(jnp.float32), ref, atol=1e-3, rtol=1e-3)

    # Also exercise the non-f32-output kernel (scratch accumulator + final cast).
    out_bf16 = classifier_forward(
        x.astype(jnp.bfloat16), w_p, b_p, in_sz, out_sz, force_pallas=True
    )
    out_bf16 = jax.block_until_ready(out_bf16)
    assert out_bf16.dtype == jnp.bfloat16
    assert jnp.allclose(out_bf16.astype(jnp.float32), ref, atol=3e-2, rtol=3e-2)

    # XLA fallback path (same compute dtype) must agree with the Pallas path.
    out_fb = classifier_forward(x, w_p, b_p, in_sz, out_sz, force_pallas=False)
    assert jnp.allclose(out_fb.astype(jnp.float32), ref, atol=1e-3, rtol=1e-3)

    print("KERNEL_OK")
</pallas_src>

<mosaic_0001>
module attributes {stable_mosaic.version = 11 : i64} {
  func.func @_linear_kernel_f32out(%arg0: i32, %arg1: i32, %arg2: i32, %arg3: memref<16x128xbf16, #tpu.memory_space<vmem>>, %arg4: memref<128x128xbf16, #tpu.memory_space<vmem>>, %arg5: memref<1x128xf32, #tpu.memory_space<vmem>>, %arg6: memref<16x128xf32, #tpu.memory_space<vmem>>) attributes {dimension_semantics = [#tpu.dimension_semantics<parallel>, #tpu.dimension_semantics<parallel>, #tpu.dimension_semantics<arbitrary>], iteration_bounds = array<i64: 1, 1, 1>, scalar_prefetch = 0 : i64, scratch_operands = 0 : i64, tpu.core_type = #tpu.core_type<tc>, window_params = [{transform_indices = @transform_0, window_bounds = array<i64: 16, 128>}, {transform_indices = @transform_1, window_bounds = array<i64: 128, 128>}, {transform_indices = @transform_2, window_bounds = array<i64: 1, 128>}, {transform_indices = @transform_3, window_bounds = array<i64: 16, 128>}]} {
    %c0_i32 = arith.constant 0 : i32
    %0 = arith.cmpi eq, %arg2, %c0_i32 : i32
    %1 = arith.extui %0 : i1 to i32
    %c0_i32_0 = arith.constant 0 : i32
    %2 = arith.cmpi ne, %1, %c0_i32_0 : i32
    scf.if %2 {
      %c0_8 = arith.constant 0 : index
      %c0_9 = arith.constant 0 : index
      %9 = vector.load %arg5[%c0_8, %c0_9] : memref<1x128xf32, #tpu.memory_space<vmem>>, vector<1x128xf32>
      %10 = vector.shape_cast %9 : vector<1x128xf32> to vector<1x128xf32>
      %11 = vector.broadcast %10 : vector<1x128xf32> to vector<16x128xf32>
      %c0_10 = arith.constant 0 : index
      %c0_11 = arith.constant 0 : index
      %12 = vector.load %arg6[%c0_10, %c0_11] : memref<16x128xf32, #tpu.memory_space<vmem>>, vector<16x128xf32>
      tpu.vector_store %arg6[%c0_10, %c0_11], %11 {strides = array<i32>} : memref<16x128xf32, #tpu.memory_space<vmem>>, vector<16x128xf32>,
    } else {
    }
    %c0 = arith.constant 0 : index
    %c0_1 = arith.constant 0 : index
    %3 = vector.load %arg6[%c0, %c0_1] : memref<16x128xf32, #tpu.memory_space<vmem>>, vector<16x128xf32>
    %c0_2 = arith.constant 0 : index
    %c0_3 = arith.constant 0 : index
    %4 = vector.load %arg3[%c0_2, %c0_3] : memref<16x128xbf16, #tpu.memory_space<vmem>>, vector<16x128xbf16>
    %c0_4 = arith.constant 0 : index
    %c0_5 = arith.constant 0 : index
    %5 = vector.load %arg4[%c0_4, %c0_5] : memref<128x128xbf16, #tpu.memory_space<vmem>>, vector<128x128xbf16>
    %cst = arith.constant dense<0.000000e+00> : vector<16x128xf32>
    %6 = tpu.matmul %4, %5, %cst {dimension_numbers = #tpu.dot_dimension_numbers<[1], [0], [0], [1], [0, 0, 1, 1], [], []>} : vector<16x128xbf16>, vector<128x128xbf16>, vector<16x128xf32> -> vector<16x128xf32>
    %7 = arith.addf %3, %6 : vector<16x128xf32>
    %c0_6 = arith.constant 0 : index
    %c0_7 = arith.constant 0 : index
    %8 = vector.load %arg6[%c0_6, %c0_7] : memref<16x128xf32, #tpu.memory_space<vmem>>, vector<16x128xf32>
    tpu.vector_store %arg6[%c0_6, %c0_7], %7 {strides = array<i32>} : memref<16x128xf32, #tpu.memory_space<vmem>>, vector<16x128xf32>,
    return
  }
  func.func @transform_0(%arg0: i32, %arg1: i32, %arg2: i32) -> (i32, i32) {
    %c0_i32 = arith.constant 0 : i32
    return %arg0, %arg2 : i32, i32
  }
  func.func @transform_1(%arg0: i32, %arg1: i32, %arg2: i32) -> (i32, i32) {
    %c0_i32 = arith.constant 0 : i32
    return %arg2, %arg1 : i32, i32
  }
  func.func @transform_2(%arg0: i32, %arg1: i32, %arg2: i32) -> (i32, i32) {
    %c0_i32 = arith.constant 0 : i32
    %c0_i32_0 = arith.constant 0 : i32
    return %c0_i32, %arg1 : i32, i32
  }
  func.func @transform_3(%arg0: i32, %arg1: i32, %arg2: i32) -> (i32, i32) {
    %c0_i32 = arith.constant 0 : i32
    return %arg0, %arg1 : i32, i32
  }
}

</mosaic_0001>

<bundles_post_ra>
// kernel: tpu_custom_call.1
= control target key start
LH: loop header
LB: loop body
LE: loop exit
PB: predicated region body
PF: predicated region fallthrough
CT: control target
= control target key end

     0   :  { %8 = vsyncpa [#allocation3], 0  ;;  %s391_s0 = inlined_call_operand.hbm [shape: bf16[16,128], index: 0, kind: input, shape index: {}]   ;;  %s392_s1 = inlined_call_operand.hbm [shape: bf16[128,128], index: 1, kind: input, shape index: {}]   ;;  %s393_s2 = inlined_call_operand.vmem [shape: f32[1,128], index: 2, kind: input, shape index: {}]   ;;  %s394_s3 = inlined_call_operand.hbm [shape: f32[16,128], index: 3, kind: output, shape index: {}]  }
   0x1   :  { %9 = vsyncpa [#allocation6], 0 }
   0x2   :  { %10 = vsyncpa [#allocation4], 0  ;;  %s323_s12 = smov [#allocation2]   ;;  %s251_s16 = scalar_lea.hbm %s391_s0, 128 }
   0x3   :  { %s16_s13 = sshll.u32 %s323_s12, 4  ;;  %p252_p0 = scmp.ne.s32.totalorder %s391_s0, %s251_s16  ;;  %s17_s13 = int_to_ptr.vmem [resolvable:$true] %s16_s13 }
   0x4   :  { %p255_p1 = scmp.lt.u32.totalorder %s251_s16, %s391_s0 }
   0x6   :  { %p257_p2 = pnand %p255_p1, %p252_p0 }
   0x8   :  { %260 = shalt.err (!%p257_p2)
}
   0x9   :  { %s261_s21 = scalar_lea.vmem %s17_s13, 128  ;;  %p266_p4 = scmp.lt.s32.totalorder %s17_s13, %s17_s13 }
   0xa   :  { %p262_p3 = scmp.ne.s32.totalorder %s17_s13, %s261_s21  ;;  %p267_p5 = scmp.lt.s32.totalorder %s261_s21, %s261_s21 }
   0xc   :  { %p268_p6 = por %p267_p5, %p266_p4 }
   0xe   :  { %p269_p7 = pnand %p268_p6, %p262_p3 }
  0x10   :  { %272 = shalt.err (!%p269_p7)
}
  0x11   :  { %s324_s22 = smov 64   ;;  %s325_s23 = smov 4  }
  0x12   :  { %22 = dma.hbm_to_vmem [thread:$0]  %s391_s0, 128, %s17_s13, [#allocation3], %s324_s22, %s324_s22, %s325_s23  }
  0x13   :  { %s326_s26 = smov [#allocation5]   ;;  %s273_s30 = scalar_lea.hbm %s392_s1, 1024 }
  0x14   :  { %s28_s27 = sshll.u32 %s326_s26, 4  ;;  %p274_p8 = scmp.ne.s32.totalorder %s392_s1, %s273_s30  ;;  %s29_s27 = int_to_ptr.vmem [resolvable:$true] %s28_s27 }
  0x15   :  { %p277_p9 = scmp.lt.u32.totalorder %s273_s30, %s392_s1 }
  0x17   :  { %p279_p10 = pnand %p277_p9, %p274_p8 }
  0x19   :  { %282 = shalt.err (!%p279_p10)
}
  0x1a   :  { %s283_s8 = scalar_lea.vmem %s29_s27, 1024  ;;  %p288_p12 = scmp.lt.s32.totalorder %s29_s27, %s29_s27 }
  0x1b   :  { %p284_p11 = scmp.ne.s32.totalorder %s29_s27, %s283_s8  ;;  %p289_p13 = scmp.lt.s32.totalorder %s283_s8, %s283_s8 }
  0x1d   :  { %p290_p0 = por %p289_p13, %p288_p12 }
  0x1f   :  { %p291_p1 = pnand %p290_p0, %p284_p11 }
  0x21   :  { %294 = shalt.err (!%p291_p1)
}
  0x22   :  { %34 = dma.hbm_to_vmem [thread:$0]  %s392_s1, 1024, %s29_s27, [#allocation6], %s324_s22, %s324_s22, %s325_s23  }
  0x23   :  { %317 = dma.done.wait [#allocation3], 128  }
  0x24   :  { %318 = vsyncadd [#allocation3], 4294967168 }
  0x25   :  { %319 = dma.done.wait [#allocation6], 1024  }
  0x26   :  { %320 = vsyncadd [#allocation6], 4294966272  ;;  %v327_v0 = vmov 0.0   ;;  %vm328_vm0 = vmmov 0   ;;  %v242_v1 = vld [vmem:[#allocation5] sm:$0xff]   ;;  %v243_v2 = vld [vmem:[#allocation5 + $0x8] sm:$0xff]  }
  0x27   :  { %213 = vmatprep.subr.bf16.mxu0 %v327_v0  ;;  %229 = vmatprep.mubr.msk.bf16.mxu0 %vm328_vm0, %v327_v0  ;;  %v244_v3 = vld [vmem:[#allocation5 + $0x10] sm:$0xff]   ;;  %v245_v4 = vld [vmem:[#allocation5 + $0x18] sm:$0xff]   ;;  %v246_v5 = vld [vmem:[#allocation5 + $0x20] sm:$0xff]   ;;  %s329_s11 = smov [#allocation7]  }
  0x28   :  { %214 = vmatpush3.bf16.msra.mxu0 %v242_v1  ;;  %v247_v6 = vld [vmem:[#allocation5 + $0x28] sm:$0xff]   ;;  %v248_v7 = vld [vmem:[#allocation5 + $0x30] sm:$0xff]   ;;  %v249_v8 = vld [vmem:[#allocation5 + $0x38] sm:$0xff]   ;;  %s181_s12 = sshll.u32 %s329_s11, 4  ;;  %s182_s12 = int_to_ptr.vmem [resolvable:$true] %s181_s12 }
  0x29   :  { %215 = vmatprep.subr.bf16.mxu0 %v327_v0  ;;  %v250_v9 = vld [vmem:[#allocation2] sm:$0xff]   ;;  %s295_s13 = scalar_lea.vmem %s182_s12, 256  ;;  %p300_p3 = scmp.lt.s32.totalorder %s182_s12, %s182_s12 }
  0x2a   :  { %v194_v10 = vld [vmem:[%s393_s2] ss:$0 sm:$0xff]  ;;  %p296_p2 = scmp.ne.s32.totalorder %s182_s12, %s295_s13  ;;  %p301_p4 = scmp.lt.s32.totalorder %s295_s13, %s295_s13 }
  0x2c   :  { %216 = vmatpush3.bf16.msra.mxu0 %v243_v2  ;;  %p302_p5 = por %p301_p4, %p300_p3 }
  0x2d   :  { %217 = vmatprep.subr.bf16.mxu0 %v327_v0 }
  0x2e   :  { %p303_p6 = pnand %p302_p5, %p296_p2 }
  0x30   :  { %218 = vmatpush3.bf16.msra.mxu0 %v244_v3 }
  0x31   :  { %219 = vmatprep.subr.bf16.mxu0 %v327_v0 }
  0x34   :  { %220 = vmatpush3.bf16.msra.mxu0 %v245_v4 }
  0x35   :  { %221 = vmatprep.subr.bf16.mxu0 %v327_v0 }
  0x38   :  { %222 = vmatpush3.bf16.msra.mxu0 %v246_v5 }
  0x39   :  { %223 = vmatprep.subr.bf16.mxu0 %v327_v0 }
  0x3c   :  { %224 = vmatpush3.bf16.msra.mxu0 %v247_v6 }
  0x3d   :  { %225 = vmatprep.subr.bf16.mxu0 %v327_v0 }
  0x40   :  { %226 = vmatpush3.bf16.msra.mxu0 %v248_v7 }
  0x41   :  { %227 = vmatprep.subr.bf16.mxu0 %v327_v0 }
  0x44   :  { %228 = vmatpush3.bf16.msra.mxu0 %v249_v8 }
  0x47   :  { %230 = vmatmul.mubr.bf16.vlgmr.msra.gmra.mrb[0].mxu0 %v250_v9 }
 0x11a   :  { %v165_v11 = vpop.f32.mrb[0].mxu0 }
 0x11b   :  { %v172_v12 = vadd.f32 %v194_v10, %v165_v11  ;;  %v231_v13 = vpop.f32.mrb[1].mxu0 }
 0x11c   :  { %v168_v14 = vpop.f32.mrb[2].mxu0 }
 0x11d   :  { %174 = vst [vmem:[#allocation7] sm:$0xff] %v172_v12  ;;  %v173_v15 = vadd.f32 %v194_v10, %v168_v14  ;;  %v232_v16 = vpop.f32.mrb[3].mxu0 }
 0x11f   :  { %175 = vst [vmem:[#allocation7 + $0x8] sm:$0xff] %v173_v15 }
 0x120   :  { %306 = shalt.err (!%p303_p6)
}
 0x121   :  { %s307_s15 = scalar_lea.hbm %s394_s3, 256 }
 0x122   :  { %p308_p7 = scmp.ne.s32.totalorder %s394_s3, %s307_s15  ;;  %p311_p8 = scmp.lt.u32.totalorder %s307_s15, %s394_s3 }
 0x124   :  { %p313_p9 = pnand %p311_p8, %p308_p7 }
 0x126   :  { %316 = shalt.err (!%p313_p9)
}
 0x127   :  { %s330_s20 = smov 128   ;;  %s331_s21 = smov 8  }
 0x128   :  { %187 = dma.vmem_to_hbm [thread:$0]  %s182_s12, 256, %s394_s3, [#allocation4], %s330_s20, %s330_s20, %s331_s21  }
 0x129   :  { %321 = dma.done.wait [#allocation4], 256  }
 0x12a   :  { %322 = vsyncadd [#allocation4], 4294967040 }
 0x12b   :  { %191 = vsyncpa [#allocation3], 1 }
 0x12c   :  { %192 = vsyncpa [#allocation6], 1 }
 0x12d   :  { %193 = vsyncpa [#allocation4], 1 }

</bundles_post_ra>
